<compile_context>
chip_gen: v6e
topology: v6e:2x2x1
jax: 0.10.0
libtpu: 0.0.40
codegen_flags: <defaults>
</compile_context>

<pallas_src>
import math
import functools

import jax
import jax.numpy as jnp
from jax.experimental import pallas as pl
from jax.experimental.pallas import tpu as pltpu


# ----------------------------------------------------------------------------
# Parameter (buffer) setup — mirrors PositionalEncoding.__init__
# ----------------------------------------------------------------------------
def make_positional_encoding_table(d_model: int, max_len: int = 5000,
                                   dtype=jnp.float32):
    position = jnp.arange(max_len, dtype=jnp.float32)[:, None]            # (L, 1)
    div_term = jnp.exp(jnp.arange(0, d_model, 2, dtype=jnp.float32)
                       * (-math.log(10000.0) / d_model))                  # (D/2,)
    pe = jnp.zeros((max_len, 1, d_model), dtype=jnp.float32)
    pe = pe.at[:, 0, 0::2].set(jnp.sin(position * div_term))
    pe = pe.at[:, 0, 1::2].set(jnp.cos(position * div_term))
    return pe.astype(dtype)                                               # (L, 1, D)


# ----------------------------------------------------------------------------
# Tile-size / VMEM-budget helpers (generation-aware, layout-legal)
# ----------------------------------------------------------------------------
def _round_up(x: int, m: int) -> int:
    return (x + m - 1) // m * m


def _default_vmem_budget_bytes() -> int:
    """~3/8 of physical VMEM: 48 MiB on v5e/v6e (128 MiB), 24 MiB on v7x (64 MiB)."""
    try:
        cap = int(pltpu.get_tpu_info().vmem_capacity_bytes)
    except Exception:                      # non-TPU backend / interpret mode
        cap = 128 * 1024 * 1024
    return max(8 * 1024 * 1024, min(48 * 1024 * 1024, (cap * 3) // 8))


def _pick_seq_tile(S: int, per_row_bytes: int, budget_bytes: int,
                   *, seq_is_full_dim: bool) -> int:
    """Seq-rows per tile: VMEM-budgeted, >= ~8 grid steps for large S, layout-legal."""
    ts = max(1, budget_bytes // max(1, per_row_bytes))
    ts = min(ts, max(512, pl.cdiv(S, 8)))   # keep several grid steps (overlap / v7x 2-TC)
    ts = min(ts, S)
    if ts == S and seq_is_full_dim:
        return int(ts)                      # block dim == full array dim: always legal
    if ts % 8 != 0:                         # ts is the sublane dim of the 2-D pe block
        ts = ts - ts % 8 if ts > 8 else min(8, S)
    return int(max(1, min(ts, S)))


# ----------------------------------------------------------------------------
# Pallas kernels
# ----------------------------------------------------------------------------
def _pe_add_kernel(x_ref, pe_ref, o_ref):
    x = x_ref[...]
    pe = pe_ref[...]
    if x.ndim == 3:                         # broadcast path: x (ts,B,D), pe (ts,D)
        pe = pe[:, None, :]
    o_ref[...] = (x + pe).astype(o_ref.dtype)


def _pe_add_dropout_prng_kernel(seed_ref, x_ref, pe_ref, o_ref, *,
                                drop_threshold, scale):
    # Training path, on-chip PRNG (TPU only).
    x = x_ref[...]
    pe = pe_ref[...]
    if x.ndim == 3:
        pe = pe[:, None, :]
    y = x + pe
    # Decorrelated per-block stream: hash (seed, block index), not seed + index.
    pltpu.prng_seed(seed_ref[0], pl.program_id(0))
    bits = pltpu.bitcast(pltpu.prng_random_bits(y.shape), jnp.uint32)
    keep = bits >= jnp.uint32(drop_threshold)     # P(drop) = threshold / 2^32 = p
    o_ref[...] = jnp.where(keep, y * scale, 0.0).astype(o_ref.dtype)


def _pe_add_dropout_bits_kernel(x_ref, pe_ref, bits_ref, o_ref, *,
                                drop_threshold, scale):
    # Portable training path: random bits generated wrapper-side (works in
    # interpret / CPU mode where pltpu.prng_seed has no lowering).
    x = x_ref[...]
    pe = pe_ref[...]
    if x.ndim == 3:
        pe = pe[:, None, :]
    y = x + pe
    keep = bits_ref[...] >= jnp.uint32(drop_threshold)
    o_ref[...] = jnp.where(keep, y * scale, 0.0).astype(o_ref.dtype)


# ----------------------------------------------------------------------------
# Wrapper
# ----------------------------------------------------------------------------
def positional_encoding_forward(x, pe, *, dropout_p: float = 0.1,
                                training: bool = False, seed: int = 0,
                                vmem_budget_bytes: int | None = None,
                                use_onchip_prng: bool | None = None,
                                donate_x: bool = False):
    """x: (S, B, D); pe: (max_len, 1, D) or (max_len, D). Returns dropout(x + pe[:S])."""
    S, B, D = x.shape
    pe2d = pe.reshape(pe.shape[0], pe.shape[-1]) if pe.ndim == 3 else pe
    assert pe2d.shape[-1] == D, "pe d_model mismatch"
    assert pe2d.shape[0] >= S, "sequence longer than positional-encoding table"

    apply_dropout = bool(training) and float(dropout_p) != 0.0
    if apply_dropout and not (0.0 < float(dropout_p) < 1.0):
        raise ValueError(f"dropout_p must be in [0, 1), got {dropout_p}")
    if use_onchip_prng is None:
        # On-chip PRNG only lowers on the TPU backend; fall back elsewhere.
        use_onchip_prng = (jax.default_backend() == "tpu")
    bits_input = apply_dropout and not use_onchip_prng

    if vmem_budget_bytes is None:
        vmem_budget_bytes = _default_vmem_budget_bytes()

    itemsize = x.dtype.itemsize
    collapsed = (B < 8) or (D % 128 != 0) or (S < 8)

    if collapsed:
        # Lane-dense 2-D view; pe pre-tiled over batch (only the S rows we need).
        BD = B * D
        x_work = x.reshape(S, BD)
        pe_work = jnp.tile(pe2d[:S].astype(x.dtype), (1, B))          # (S, B*D)
        row_main = _round_up(BD, 128) * itemsize
        row_pe = row_main
        x_block = (None, BD)      # placeholder; filled with ts below
        seq_is_full_dim = True
        def make_x_spec(ts): return pl.BlockSpec((ts, BD), lambda i, *_: (i, 0))
        def make_pe_spec(ts): return pl.BlockSpec((ts, BD), lambda i, *_: (i, 0))
        out_struct_shape = (S, BD)
    else:
        # 3-D x tiles + dense 2-D pe tiles (no 1->8 sublane pad, no wrapper pe copy).
        x_work = x
        pe_work = pe2d.astype(x.dtype)                                 # (L, D)
        row_main = _round_up(B, 8) * _round_up(D, 128) * itemsize
        row_pe = _round_up(D, 128) * pe_work.dtype.itemsize
        seq_is_full_dim = False
        def make_x_spec(ts): return pl.BlockSpec((ts, B, D), lambda i, *_: (i, 0, 0))
        def make_pe_spec(ts): return pl.BlockSpec((ts, D), lambda i, *_: (i, 0))
        out_struct_shape = (S, B, D)

    # VMEM accounting: double-buffered streams + dropout-path in-kernel temps.
    n_main_streams = 2 + (1 if bits_input else 0)          # x-in, out, (+bits-in)
    extra_temps = 3 if apply_dropout else 0                # u32 bits / mask / f32 temp
    per_row = 2 * (n_main_streams * row_main + row_pe) + extra_temps * row_main
    ts = _pick_seq_tile(S, per_row, vmem_budget_bytes, seq_is_full_dim=seq_is_full_dim)
    grid = (pl.cdiv(S, ts),)

    compiler_params = pltpu.CompilerParams(
        dimension_semantics=("parallel",),                 # shard S-tiles across TCs (v7x)
        vmem_limit_bytes=int(max(vmem_budget_bytes, per_row * ts) + 16 * 1024 * 1024),
    )
    out_shape = jax.ShapeDtypeStruct(out_struct_shape, x.dtype)
    x_spec, pe_spec = make_x_spec(ts), make_pe_spec(ts)

    if not apply_dropout:
        # nn.Dropout in eval mode is the identity.
        grid_spec = pltpu.PrefetchScalarGridSpec(
            num_scalar_prefetch=0, grid=grid,
            in_specs=[x_spec, pe_spec], out_specs=x_spec)
        out = pl.pallas_call(
            _pe_add_kernel, out_shape=out_shape, grid_spec=grid_spec,
            compiler_params=compiler_params,
            input_output_aliases=({0: 0} if donate_x else {}),
        )(x_work, pe_work)
        return out.reshape(S, B, D)

    # Training mode: Bernoulli keep-prob (1-p) with 1/(1-p) scaling (inverted dropout).
    # NOTE: matches nn.Dropout(p) semantics; the random stream cannot match torch's.
    drop_threshold = min(int(round(float(dropout_p) * 2.0 ** 32)), 2 ** 32 - 1)
    scale = 1.0 / (1.0 - float(dropout_p))

    if use_onchip_prng:
        seed_arr = jnp.asarray([seed], dtype=jnp.int32)
        grid_spec = pltpu.PrefetchScalarGridSpec(
            num_scalar_prefetch=1, grid=grid,              # seed lands in SMEM
            in_specs=[x_spec, pe_spec], out_specs=x_spec)
        out = pl.pallas_call(
            functools.partial(_pe_add_dropout_prng_kernel,
                              drop_threshold=drop_threshold, scale=scale),
            out_shape=out_shape, grid_spec=grid_spec,
            compiler_params=compiler_params,
            input_output_aliases=({1: 0} if donate_x else {}),
        )(seed_arr, x_work, pe_work)
        return out.reshape(S, B, D)

    # Portable fallback: wrapper-side uint32 bits streamed through the same tiling.
    bits = jax.random.bits(jax.random.PRNGKey(seed), x_work.shape, dtype=jnp.uint32)
    grid_spec = pltpu.PrefetchScalarGridSpec(
        num_scalar_prefetch=0, grid=grid,
        in_specs=[x_spec, pe_spec, x_spec], out_specs=x_spec)
    out = pl.pallas_call(
        functools.partial(_pe_add_dropout_bits_kernel,
                          drop_threshold=drop_threshold, scale=scale),
        out_shape=out_shape, grid_spec=grid_spec,
        compiler_params=compiler_params,
        input_output_aliases=({0: 0} if donate_x else {}),
    )(x_work, pe_work, bits)
    return out.reshape(S, B, D)


# ----------------------------------------------------------------------------
# Demo / smoke test
# ----------------------------------------------------------------------------
if __name__ == "__main__":
    d_model, seq_len, batch, max_len = 32, 8, 2, 5000

    key = jax.random.PRNGKey(0)
    x = jax.random.normal(key, (seq_len, batch, d_model), dtype=jnp.float32)
    pe = make_positional_encoding_table(d_model, max_len=max_len, dtype=x.dtype)
    ref = x + pe[:seq_len]

    # 1) Eval-mode forward (dropout is identity), tiny collapsed path.
    out = jax.block_until_ready(
        positional_encoding_forward(x, pe, dropout_p=0.1, training=False))
    assert out.shape == (seq_len, batch, d_model)
    assert jnp.allclose(out, ref, atol=1e-6, rtol=1e-6)

    # 2) Lane-dense collapsed path (B*D multiple of 128), multi-step grid with a
    #    ragged final tile (small VMEM budget on purpose to force pipelining).
    S2, B2, D2 = 300, 4, 256
    x2 = jax.random.normal(jax.random.PRNGKey(1), (S2, B2, D2), dtype=jnp.float32)
    pe2 = make_positional_encoding_table(D2, max_len=512, dtype=x2.dtype)
    out2 = jax.block_until_ready(
        positional_encoding_forward(x2, pe2, training=False,
                                    vmem_budget_bytes=1 * 1024 * 1024))
    assert jnp.allclose(out2, x2 + pe2[:S2], atol=1e-6, rtol=1e-6)

    # 3) Broadcast path (B >= 8, D % 128 == 0): 3-D x tiles + dense 2-D pe tiles,
    #    multi-step grid (small budget again).
    S3, B3, D3 = 64, 8, 128
    x3 = jax.random.normal(jax.random.PRNGKey(2), (S3, B3, D3), dtype=jnp.float32)
    pe3 = make_positional_encoding_table(D3, max_len=256, dtype=x3.dtype)
    out3 = jax.block_until_ready(
        positional_encoding_forward(x3, pe3, training=False,
                                    vmem_budget_bytes=256 * 1024))
    assert jnp.allclose(out3, x3 + pe3[:S3], atol=1e-6, rtol=1e-6)

    # 4) Training-mode smoke test: every element is 0 or (x + pe) / (1 - p).
    p = 0.5
    out_tr = jax.block_until_ready(
        positional_encoding_forward(x, pe, dropout_p=p, training=True, seed=123))
    expected = ref / (1.0 - p)
    is_zero = jnp.abs(out_tr) <= 1e-6
    is_scaled = jnp.abs(out_tr - expected) <= 1e-4
    assert bool(jnp.all(is_zero | is_scaled))

    print("KERNEL_OK")
</pallas_src>

<mosaic_0001>
module attributes {stable_mosaic.version = 11 : i64} {
  func.func @_pe_add_kernel(%arg0: i32, %arg1: memref<8x64xf32, #tpu.memory_space<vmem>>, %arg2: memref<8x64xf32, #tpu.memory_space<vmem>>, %arg3: memref<8x64xf32, #tpu.memory_space<vmem>>) attributes {dimension_semantics = [#tpu.dimension_semantics<parallel>], iteration_bounds = array<i64: 1>, scalar_prefetch = 0 : i64, scratch_operands = 0 : i64, tpu.core_type = #tpu.core_type<tc>, window_params = [{transform_indices = @transform_0, window_bounds = array<i64: 8, 64>}, {transform_indices = @transform_1, window_bounds = array<i64: 8, 64>}, {transform_indices = @transform_2, window_bounds = array<i64: 8, 64>}]} {
    %c0 = arith.constant 0 : index
    %c0_0 = arith.constant 0 : index
    %0 = vector.load %arg1[%c0, %c0_0] : memref<8x64xf32, #tpu.memory_space<vmem>>, vector<8x64xf32>
    %c0_1 = arith.constant 0 : index
    %c0_2 = arith.constant 0 : index
    %1 = vector.load %arg2[%c0_1, %c0_2] : memref<8x64xf32, #tpu.memory_space<vmem>>, vector<8x64xf32>
    %2 = arith.addf %0, %1 : vector<8x64xf32>
    %c0_3 = arith.constant 0 : index
    %c0_4 = arith.constant 0 : index
    %3 = vector.load %arg3[%c0_3, %c0_4] : memref<8x64xf32, #tpu.memory_space<vmem>>, vector<8x64xf32>
    tpu.vector_store %arg3[%c0_3, %c0_4], %2 {strides = array<i32>} : memref<8x64xf32, #tpu.memory_space<vmem>>, vector<8x64xf32>,
    return
  }
  func.func @transform_0(%arg0: i32) -> (i32, i32) {
    %c0_i32 = arith.constant 0 : i32
    %c0_i32_0 = arith.constant 0 : i32
    return %arg0, %c0_i32 : i32, i32
  }
  func.func @transform_1(%arg0: i32) -> (i32, i32) {
    %c0_i32 = arith.constant 0 : i32
    %c0_i32_0 = arith.constant 0 : i32
    return %arg0, %c0_i32 : i32, i32
  }
  func.func @transform_2(%arg0: i32) -> (i32, i32) {
    %c0_i32 = arith.constant 0 : i32
    %c0_i32_0 = arith.constant 0 : i32
    return %arg0, %c0_i32 : i32, i32
  }
}

</mosaic_0001>

<bundles_post_ra>
// kernel: tpu_custom_call.1
= control target key start
LH: loop header
LB: loop body
LE: loop exit
PB: predicated region body
PF: predicated region fallthrough
CT: control target
= control target key end

     0   :  { %7 = vsyncpa [#allocation3], 0  ;;  %s153_s0 = inlined_call_operand.hbm [shape: f32[8,64], index: 0, kind: input, shape index: {}]   ;;  %s154_s1 = inlined_call_operand.hbm [shape: f32[8,64], index: 1, kind: input, shape index: {}]   ;;  %s155_s2 = inlined_call_operand.hbm [shape: f32[8,64], index: 2, kind: output, shape index: {}]  }
   0x1   :  { %8 = vsyncpa [#allocation6], 0 }
   0x2   :  { %9 = vsyncpa [#allocation4], 0  ;;  %s126_s9 = smov [#allocation2]   ;;  %s127_s11 = smov [#allocation5]  }
   0x3   :  { %s16_s10 = sshll.u32 %s126_s9, 4  ;;  %s26_s12 = sshll.u32 %s127_s11, 4  ;;  %s17_s10 = int_to_ptr.vmem [resolvable:$true] %s16_s10  ;;  %s27_s12 = int_to_ptr.vmem [resolvable:$true] %s26_s12 }
   0x4   :  { %s68_s13 = scalar_lea.vmem %s17_s10, 128  ;;  %p73_p1 = scmp.lt.s32.totalorder %s17_s10, %s17_s10 }
   0x5   :  { %p69_p0 = scmp.ne.s32.totalorder %s17_s10, %s68_s13  ;;  %p74_p2 = scmp.lt.s32.totalorder %s68_s13, %s68_s13 }
   0x7   :  { %p75_p3 = por %p74_p2, %p73_p1 }
   0x9   :  { %p76_p4 = pnand %p75_p3, %p69_p0 }
   0xb   :  { %79 = shalt.err (!%p76_p4)
}
   0xc   :  { %19 = dma.hbm_to_vmem [thread:$0]  %s153_s0, 128, %s17_s10, [#allocation3]  }
   0xd   :  { %s88_s16 = scalar_lea.vmem %s27_s12, 128  ;;  %p93_p6 = scmp.lt.s32.totalorder %s27_s12, %s27_s12 }
   0xe   :  { %p89_p5 = scmp.ne.s32.totalorder %s27_s12, %s88_s16  ;;  %p94_p7 = scmp.lt.s32.totalorder %s88_s16, %s88_s16 }
  0x10   :  { %p95_p8 = por %p94_p7, %p93_p6 }
  0x12   :  { %p96_p9 = pnand %p95_p8, %p89_p5 }
  0x14   :  { %99 = shalt.err (!%p96_p9)
}
  0x15   :  { %29 = dma.hbm_to_vmem [thread:$0]  %s154_s1, 128, %s27_s12, [#allocation6]  }
  0x16   :  { %120 = dma.done.wait [#allocation3], 128  }
  0x17   :  { %121 = vsyncadd [#allocation3], 4294967168 }
  0x18   :  { %122 = dma.done.wait [#allocation6], 128  }
  0x19   :  { %123 = vsyncadd [#allocation6], 4294967168  ;;  %s128_s19 = smov [#allocation7]   ;;  %v36_v0 = vld [vmem:[#allocation2] sm:$0xff]  ;;  %v37_v1 = vld [vmem:[#allocation5] sm:$0xff]  ;;  %vm39_vm0 = vcmask 523264  }
  0x1a   :  { %s47_s20 = sshll.u32 %s128_s19, 4  ;;  %v38_v2 = vadd.f32 %v37_v1, %v36_v0  ;;  %s48_s20 = int_to_ptr.vmem [resolvable:$true] %s47_s20 }
  0x1b   :  { %s100_s0 = scalar_lea.vmem %s48_s20, 128  ;;  %p105_p11 = scmp.lt.s32.totalorder %s48_s20, %s48_s20 }
  0x1c   :  { %40 = vst.msk [vmem:[#allocation7] sm:$0xff] %vm39_vm0, %v38_v2  ;;  %p101_p10 = scmp.ne.s32.totalorder %s48_s20, %s100_s0  ;;  %p106_p12 = scmp.lt.s32.totalorder %s100_s0, %s100_s0 }
  0x1e   :  { %p107_p13 = por %p106_p12, %p105_p11 }
  0x20   :  { %p108_p0 = pnand %p107_p13, %p101_p10 }
  0x22   :  { %111 = shalt.err (!%p108_p0)
}
  0x23   :  { %50 = dma.vmem_to_hbm [thread:$0]  %s48_s20, 128, %s155_s2, [#allocation4]  }
  0x24   :  { %124 = dma.done.wait [#allocation4], 128  }
  0x25   :  { %125 = vsyncadd [#allocation4], 4294967168 }
  0x26   :  { %54 = vsyncpa [#allocation3], 1 }
  0x27   :  { %55 = vsyncpa [#allocation6], 1 }
  0x28   :  { %56 = vsyncpa [#allocation4], 1 }

</bundles_post_ra>
